<compile_context>
chip_gen: v6e
topology: v6e:2x2x1
jax: 0.10.0
libtpu: 0.0.40
codegen_flags: <defaults>
</compile_context>

<pallas_src>
import jax
import jax.numpy as jnp
from jax.experimental import pallas as pl
from jax.experimental.pallas import tpu as pltpu


def _round_up(x, m):
    return ((x + m - 1) // m) * m


def _generate_node_kernel(x_ref, w_ref, b_ref, out_ref):
    # x_ref  : (TB, 2H+E)  concat([node_emb, context, label_emb]) tile
    # w_ref  : (2H+E, 4H)  fused weights, columns ordered [l | r | lg | rg] (resident)
    # b_ref  : (1, 4H)     fused bias (f32), same column order (resident)
    # out_ref: (TB, 2H)    [l_child | r_child] gated outputs
    h2 = out_ref.shape[1]                               # 2H

    # Single deep-K MXU push, f32 accumulation.
    y = jnp.dot(x_ref[...], w_ref[...], preferred_element_type=jnp.float32)
    y = y + b_ref[...]                                  # broadcast (1, 4H)

    t = jnp.tanh(y[:, :h2])                             # tanh(l), tanh(r)
    # sigmoid(z) == 0.5 * tanh(0.5 * z) + 0.5  -> one EUP op + cheap VPU ops.
    g = 0.5 * jnp.tanh(0.5 * y[:, h2:]) + 0.5           # sigmoid(lg), sigmoid(rg)

    out_ref[...] = (t * g).astype(out_ref.dtype)        # single lane-dense store


def generate_node_forward(node_embedding, node_label, current_context, params,
                          *, compute_dtype=jnp.bfloat16, tb_max=512):
    """JAX/Pallas equivalent of GenerateNode.forward (eval mode).

    node_embedding : (B, 1, H) float
    node_label     : (B,) int32 indices into the op embedding table
    current_context: (B, 1, H) float
    params: {'embedding': (op_nums, E), 'w_all': (2H+E, 4H), 'b_all': (4H,)}
            w_all columns ordered [generate_l | generate_lg | generate_r | generate_rg]
            (input-major layout, i.e. torch weights transposed at packing time).
    Returns (l_child, r_child, node_label_) just like the PyTorch module.
    """
    emb_table = params["embedding"]
    w_all = params["w_all"]
    b_all = params["b_all"]

    H = node_embedding.shape[-1]
    E = emb_table.shape[-1]
    IN = 2 * H + E
    assert w_all.shape == (IN, 4 * H)
    out_dtype = node_embedding.dtype

    # nn.Embedding lookup; the raw embedding is returned as node_label_.
    node_label_emb = jnp.take(emb_table, node_label, axis=0)            # (B, E)

    # TODO(synk): nn.Dropout(0.5) omitted (deterministic eval/inference mode).

    # squeeze(1) + single fused input  x = [node_embedding | context | label_emb].
    ne = node_embedding.reshape(-1, H)
    cc = current_context.reshape(-1, H)
    x = jnp.concatenate([ne, cc, node_label_emb], axis=1).astype(compute_dtype)
    B = x.shape[0]

    # Permute fused columns [l | lg | r | rg] -> [l | r | lg | rg] so that
    # tanh(y[:, :2H]) * sigmoid(y[:, 2H:]) is directly [l_child | r_child].
    w_perm = jnp.concatenate(
        [w_all[:, 0:H], w_all[:, 2 * H:3 * H],
         w_all[:, H:2 * H], w_all[:, 3 * H:4 * H]], axis=1).astype(compute_dtype)
    b_perm = jnp.concatenate(
        [b_all[0:H], b_all[2 * H:3 * H], b_all[H:2 * H], b_all[3 * H:4 * H]]
    ).astype(jnp.float32).reshape(1, 4 * H)

    # Pad the batch only to a sublane multiple; ragged last tile is masked.
    B_pad = _round_up(max(B, 1), 8)
    if B_pad != B:
        x = jnp.pad(x, ((0, B_pad - B), (0, 0)))

    # Tile choice: >= 2 grid steps when B > 8 (feeds both v7x TensorCores via
    # "parallel"); otherwise one maximal tile (v5e/v6e single-TC prefer big tiles).
    if B_pad <= 8:
        TB = B_pad
    else:
        TB = min(tb_max, _round_up(-(-B_pad // 2), 8))
    grid = (pl.cdiv(B_pad, TB),)

    # Explicit VMEM budget: single-buffered resident weights/bias, double-buffered
    # activation tiles, f32 accumulator headroom.  Capped at v7x's 64 MiB.
    itm = jnp.dtype(compute_dtype).itemsize
    vmem_bytes = (IN * 4 * H * itm + 4 * H * 4              # weights + bias (resident)
                  + 2 * TB * IN * itm                       # input tile (double buffer)
                  + 2 * TB * 2 * H * jnp.dtype(out_dtype).itemsize  # output tile
                  + TB * 4 * H * 4)                         # f32 accumulator
    vmem_limit = min(max(int(1.5 * vmem_bytes) + (2 << 20), 4 << 20), 64 << 20)

    out = pl.pallas_call(
        _generate_node_kernel,
        out_shape=jax.ShapeDtypeStruct((B_pad, 2 * H), out_dtype),
        grid_spec=pltpu.PrefetchScalarGridSpec(
            num_scalar_prefetch=0,
            grid=grid,
            in_specs=[
                pl.BlockSpec((TB, IN), lambda i: (i, 0)),              # x tile
                pl.BlockSpec(memory_space=pltpu.MemorySpace.VMEM),     # weights (resident)
                pl.BlockSpec(memory_space=pltpu.MemorySpace.VMEM),     # bias    (resident)
            ],
            out_specs=pl.BlockSpec((TB, 2 * H), lambda i: (i, 0)),
        ),
        compiler_params=pltpu.CompilerParams(
            dimension_semantics=("parallel",),
            vmem_limit_bytes=vmem_limit),
    )(x, w_perm, b_perm)

    out = out[:B]
    l_child = out[:, :H]
    r_child = out[:, H:]
    return l_child, r_child, node_label_emb


def _reference(node_embedding, node_label, current_context, params):
    """Plain-JAX reference matching the PyTorch module in eval mode."""
    emb = jnp.take(params["embedding"], node_label, axis=0)
    ne = node_embedding.reshape(node_embedding.shape[0], -1).astype(jnp.float32)
    cc = current_context.reshape(current_context.shape[0], -1).astype(jnp.float32)
    x = jnp.concatenate([ne, cc, emb.astype(jnp.float32)], axis=1)
    y = x @ params["w_all"].astype(jnp.float32) + params["b_all"].astype(jnp.float32)
    H = ne.shape[-1]
    l = jnp.tanh(y[:, :H]) * jax.nn.sigmoid(y[:, H:2 * H])
    r = jnp.tanh(y[:, 2 * H:3 * H]) * jax.nn.sigmoid(y[:, 3 * H:4 * H])
    return l, r, emb


if __name__ == "__main__":
    key = jax.random.PRNGKey(0)
    B = 2
    hidden_size = 32
    embedding_size = 32
    op_nums = 8

    k1, k2, k3, k4, k5, k6 = jax.random.split(key, 6)
    node_embedding = jax.random.normal(k1, (B, 1, hidden_size), dtype=jnp.float32)
    current_context = jax.random.normal(k2, (B, 1, hidden_size), dtype=jnp.float32)
    node_label = jax.random.randint(k3, (B,), 0, op_nums, dtype=jnp.int32)

    in_dim = 2 * hidden_size + embedding_size
    scale = 1.0 / jnp.sqrt(jnp.float32(in_dim))
    params = {
        "embedding": jax.random.normal(k4, (op_nums, embedding_size),
                                       dtype=jnp.float32),
        # Columns ordered [generate_l | generate_lg | generate_r | generate_rg].
        "w_all": scale * jax.random.normal(k5, (in_dim, 4 * hidden_size),
                                           dtype=jnp.float32),
        "b_all": scale * jax.random.normal(k6, (4 * hidden_size,),
                                           dtype=jnp.float32),
    }

    l_ref, r_ref, emb_ref = _reference(node_embedding, node_label,
                                       current_context, params)

    # Exact-precision path (f32 MXU feeding): tight tolerance.
    l32, r32, nl32 = generate_node_forward(
        node_embedding, node_label, current_context, params,
        compute_dtype=jnp.float32)
    jax.block_until_ready((l32, r32, nl32))
    assert l32.shape == (B, hidden_size)
    assert r32.shape == (B, hidden_size)
    assert nl32.shape == (B, embedding_size)
    assert jnp.allclose(l32, l_ref, atol=1e-4, rtol=1e-4)
    assert jnp.allclose(r32, r_ref, atol=1e-4, rtol=1e-4)
    assert jnp.allclose(nl32, emb_ref, atol=1e-6, rtol=1e-6)

    # Default fast path (bf16 MXU feeding, f32 accumulation): loose tolerance.
    l_bf, r_bf, nl_bf = generate_node_forward(
        node_embedding, node_label, current_context, params)
    jax.block_until_ready((l_bf, r_bf, nl_bf))
    assert l_bf.shape == (B, hidden_size)
    assert r_bf.shape == (B, hidden_size)
    assert jnp.allclose(l_bf, l_ref, atol=5e-2, rtol=5e-2)
    assert jnp.allclose(r_bf, r_ref, atol=5e-2, rtol=5e-2)
    assert jnp.allclose(nl_bf, emb_ref, atol=1e-6, rtol=1e-6)

    print("KERNEL_OK")
</pallas_src>

<mosaic_0001>
module attributes {stable_mosaic.version = 11 : i64} {
  func.func @_generate_node_kernel(%arg0: i32, %arg1: memref<8x96xf32, #tpu.memory_space<vmem>>, %arg2: memref<96x128xf32, #tpu.memory_space<vmem>>, %arg3: memref<1x128xf32, #tpu.memory_space<vmem>>, %arg4: memref<8x64xf32, #tpu.memory_space<vmem>>) attributes {dimension_semantics = [#tpu.dimension_semantics<parallel>], iteration_bounds = array<i64: 1>, scalar_prefetch = 0 : i64, scratch_operands = 0 : i64, tpu.core_type = #tpu.core_type<tc>, window_params = [{transform_indices = @transform_0, window_bounds = array<i64: 8, 96>}, {pipeline_mode = #tpu.pipeline_mode<synchronous>, transform_indices = @transform_1, window_bounds = array<i64: 96, 128>}, {pipeline_mode = #tpu.pipeline_mode<synchronous>, transform_indices = @transform_2, window_bounds = array<i64: 1, 128>}, {transform_indices = @transform_3, window_bounds = array<i64: 8, 64>}]} {
    %c0 = arith.constant 0 : index
    %c0_0 = arith.constant 0 : index
    %0 = vector.load %arg1[%c0, %c0_0] : memref<8x96xf32, #tpu.memory_space<vmem>>, vector<8x96xf32>
    %c0_1 = arith.constant 0 : index
    %c0_2 = arith.constant 0 : index
    %1 = vector.load %arg2[%c0_1, %c0_2] : memref<96x128xf32, #tpu.memory_space<vmem>>, vector<96x128xf32>
    %cst = arith.constant dense<0.000000e+00> : vector<8x128xf32>
    %2 = tpu.matmul %0, %1, %cst {dimension_numbers = #tpu.dot_dimension_numbers<[1], [0], [0], [1], [0, 0, 1, 1], [], []>} : vector<8x96xf32>, vector<96x128xf32>, vector<8x128xf32> -> vector<8x128xf32>
    %c0_3 = arith.constant 0 : index
    %c0_4 = arith.constant 0 : index
    %3 = vector.load %arg3[%c0_3, %c0_4] : memref<1x128xf32, #tpu.memory_space<vmem>>, vector<1x128xf32>
    %4 = vector.broadcast %3 : vector<1x128xf32> to vector<8x128xf32>
    %5 = arith.addf %2, %4 : vector<8x128xf32>
    %6 = vector.extract_strided_slice %5 {offsets = [0, 0], sizes = [8, 64], strides = [1, 1]} : vector<8x128xf32> to vector<8x64xf32>
    %7 = math.tanh %6 : vector<8x64xf32>
    %8 = vector.extract_strided_slice %5 {offsets = [0, 64], sizes = [8, 64], strides = [1, 1]} : vector<8x128xf32> to vector<8x64xf32>
    %cst_5 = arith.constant 5.000000e-01 : f32
    %9 = vector.broadcast %cst_5 : f32 to vector<8x64xf32>
    %10 = arith.mulf %9, %8 : vector<8x64xf32>
    %11 = math.tanh %10 : vector<8x64xf32>
    %cst_6 = arith.constant 5.000000e-01 : f32
    %12 = vector.broadcast %cst_6 : f32 to vector<8x64xf32>
    %13 = arith.mulf %12, %11 : vector<8x64xf32>
    %cst_7 = arith.constant 5.000000e-01 : f32
    %14 = vector.broadcast %cst_7 : f32 to vector<8x64xf32>
    %15 = arith.addf %13, %14 : vector<8x64xf32>
    %16 = arith.mulf %7, %15 : vector<8x64xf32>
    %c0_8 = arith.constant 0 : index
    %c0_9 = arith.constant 0 : index
    %17 = vector.load %arg4[%c0_8, %c0_9] : memref<8x64xf32, #tpu.memory_space<vmem>>, vector<8x64xf32>
    tpu.vector_store %arg4[%c0_8, %c0_9], %16 {strides = array<i32>} : memref<8x64xf32, #tpu.memory_space<vmem>>, vector<8x64xf32>,
    return
  }
  func.func @transform_0(%arg0: i32) -> (i32, i32) {
    %c0_i32 = arith.constant 0 : i32
    %c0_i32_0 = arith.constant 0 : i32
    return %arg0, %c0_i32 : i32, i32
  }
  func.func @transform_1(%arg0: i32) -> (i32, i32) {
    %c0_i32 = arith.constant 0 : i32
    %c0_i32_0 = arith.constant 0 : i32
    %c0_i32_1 = arith.constant 0 : i32
    return %c0_i32, %c0_i32_0 : i32, i32
  }
  func.func @transform_2(%arg0: i32) -> (i32, i32) {
    %c0_i32 = arith.constant 0 : i32
    %c0_i32_0 = arith.constant 0 : i32
    %c0_i32_1 = arith.constant 0 : i32
    return %c0_i32, %c0_i32_0 : i32, i32
  }
  func.func @transform_3(%arg0: i32) -> (i32, i32) {
    %c0_i32 = arith.constant 0 : i32
    %c0_i32_0 = arith.constant 0 : i32
    return %arg0, %c0_i32 : i32, i32
  }
}

</mosaic_0001>

<bundles_post_ra>
// kernel: tpu_custom_call.1
= control target key start
LH: loop header
LB: loop body
LE: loop exit
PB: predicated region body
PF: predicated region fallthrough
CT: control target
= control target key end

     0   :  { %8 = vsyncpa [#allocation3], 0  ;;  %s323_s0 = inlined_call_operand.hbm [shape: f32[8,96], index: 0, kind: input, shape index: {}]   ;;  %s324_s1 = inlined_call_operand.hbm [shape: f32[96,128], index: 1, kind: input, shape index: {}]   ;;  %s325_s2 = inlined_call_operand.vmem [shape: f32[1,128], index: 2, kind: input, shape index: {}]   ;;  %s326_s3 = inlined_call_operand.hbm [shape: f32[8,64], index: 3, kind: output, shape index: {}]  }
   0x1   :  { %9 = vsyncpa [#allocation6], 0 }
   0x2   :  { %10 = vsyncpa [#allocation4], 0  ;;  %s283_s12 = smov [#allocation2]   ;;  %s284_s14 = smov [#allocation5]  }
   0x3   :  { %s17_s13 = sshll.u32 %s283_s12, 4  ;;  %s26_s15 = sshll.u32 %s284_s14, 4  ;;  %s18_s13 = int_to_ptr.vmem [resolvable:$true] %s17_s13  ;;  %s27_s15 = int_to_ptr.vmem [resolvable:$true] %s26_s15 }
   0x4   :  { %s225_s16 = scalar_lea.vmem %s18_s13, 128  ;;  %p230_p1 = scmp.lt.s32.totalorder %s18_s13, %s18_s13 }
   0x5   :  { %p226_p0 = scmp.ne.s32.totalorder %s18_s13, %s225_s16  ;;  %p231_p2 = scmp.lt.s32.totalorder %s225_s16, %s225_s16 }
   0x7   :  { %p232_p3 = por %p231_p2, %p230_p1 }
   0x9   :  { %p233_p4 = pnand %p232_p3, %p226_p0 }
   0xb   :  { %236 = shalt.err (!%p233_p4)
}
   0xc   :  { %20 = dma.hbm_to_vmem [thread:$0]  %s323_s0, 128, %s18_s13, [#allocation3]  }
   0xd   :  { %s245_s19 = scalar_lea.vmem %s27_s15, 1536  ;;  %p250_p6 = scmp.lt.s32.totalorder %s27_s15, %s27_s15 }
   0xe   :  { %p246_p5 = scmp.ne.s32.totalorder %s27_s15, %s245_s19  ;;  %p251_p7 = scmp.lt.s32.totalorder %s245_s19, %s245_s19 }
  0x10   :  { %p252_p8 = por %p251_p7, %p250_p6 }
  0x12   :  { %p253_p9 = pnand %p252_p8, %p246_p5 }
  0x14   :  { %256 = shalt.err (!%p253_p9)
}
  0x15   :  { %s285_s20 = smov 128   ;;  %s286_s21 = smov 8  }
  0x16   :  { %32 = dma.hbm_to_vmem [thread:$0]  %s324_s1, 1536, %s27_s15, [#allocation6], %s285_s20, %s285_s20, %s286_s21  }
  0x17   :  { %277 = dma.done.wait [#allocation3], 128  }
  0x18   :  { %278 = vsyncadd [#allocation3], 4294967168 }
  0x19   :  { %279 = dma.done.wait [#allocation6], 1536  }
  0x1a   :  { %280 = vsyncadd [#allocation6], 4294965760  ;;  %v287_v0 = vmov 0.0   ;;  %vm288_vm0 = vmmov 0   ;;  %v53_v1 = vld [vmem:[#allocation5 + $0x58] sm:$0xff]  ;;  %v52_v2 = vld [vmem:[#allocation5 + $0x50] sm:$0xff] }
  0x1b   :  { %178 = vmatprep.subr.mxu0 %v287_v0  ;;  %202 = vmatprep.mubr.msk.f32.mxu0 %vm288_vm0, %v287_v0  ;;  %v51_v3 = vld [vmem:[#allocation5 + $0x48] sm:$0xff]  ;;  %v50_v4 = vld [vmem:[#allocation5 + $0x40] sm:$0xff]  ;;  %v49_v5 = vld [vmem:[#allocation5 + $0x38] sm:$0xff]  ;;  %vm61_vm1 = vcmask 785408   ;;  %s289_s24 = smov 64   ;;  %s290_s25 = smov [#allocation7]  }
  0x1c   :  { %179 = vmatpush3.msra.mxu0 %v53_v1  ;;  %v48_v6 = vld [vmem:[#allocation5 + $0x30] sm:$0xff]  ;;  %v47_v7 = vld [vmem:[#allocation5 + $0x28] sm:$0xff]  ;;  %v46_v8 = vld [vmem:[#allocation5 + $0x20] sm:$0xff]  ;;  %s153_s26 = sshll.u32 %s290_s25, 4  ;;  %vm145_vm2 = vcmask 523264   ;;  %s154_s26 = int_to_ptr.vmem [resolvable:$true] %s153_s26 }
  0x1d   :  { %180 = vmatprep.subr.mxu0 %v287_v0  ;;  %v45_v9 = vld [vmem:[#allocation5 + $0x18] sm:$0xff]  ;;  %v44_v10 = vld [vmem:[#allocation5 + $0x10] sm:$0xff]  ;;  %v43_v11 = vld [vmem:[#allocation5 + $0x8] sm:$0xff]  ;;  %p262_p11 = scmp.lt.s32.totalorder %s154_s26, %s154_s26 }
  0x1e   :  { %181 = vmatpush3.msra.mxu0 %v52_v2  ;;  %v42_v12 = vld [vmem:[#allocation5] sm:$0xff]  ;;  %v41_v13 = vld [vmem:[#allocation2] sm:$0xff] }
  0x1f   :  { %182 = vmatprep.subr.mxu0 %v287_v0  ;;  %v163_v14 = vld [vmem:[%s325_s2] ss:$0 sm:$0xff]  ;;  %s257_s2 = scalar_lea.vmem %s154_s26, 128 }
  0x20   :  { %183 = vmatpush3.msra.mxu0 %v51_v3  ;;  %p258_p10 = scmp.ne.s32.totalorder %s154_s26, %s257_s2  ;;  %p263_p12 = scmp.lt.s32.totalorder %s257_s2, %s257_s2 }
  0x21   :  { %184 = vmatprep.subr.mxu0 %v287_v0 }
  0x22   :  { %185 = vmatpush3.msra.mxu0 %v50_v4  ;;  %p264_p13 = por %p263_p12, %p262_p11 }
  0x23   :  { %186 = vmatprep.subr.mxu0 %v287_v0 }
  0x24   :  { %187 = vmatpush3.msra.mxu0 %v49_v5  ;;  %p265_p0 = pnand %p264_p13, %p258_p10 }
  0x25   :  { %188 = vmatprep.subr.mxu0 %v287_v0 }
  0x26   :  { %189 = vmatpush3.msra.mxu0 %v48_v6 }
  0x27   :  { %190 = vmatprep.subr.mxu0 %v287_v0 }
  0x28   :  { %191 = vmatpush3.msra.mxu0 %v47_v7 }
  0x29   :  { %192 = vmatprep.subr.mxu0 %v287_v0 }
  0x2a   :  { %193 = vmatpush3.msra.mxu0 %v46_v8 }
  0x2b   :  { %194 = vmatprep.subr.mxu0 %v287_v0 }
  0x2c   :  { %195 = vmatpush3.msra.mxu0 %v45_v9 }
  0x2d   :  { %196 = vmatprep.subr.mxu0 %v287_v0 }
  0x2e   :  { %197 = vmatpush3.msra.mxu0 %v44_v10 }
  0x2f   :  { %198 = vmatprep.subr.mxu0 %v287_v0 }
  0x30   :  { %199 = vmatpush3.msra.mxu0 %v43_v11 }
  0x31   :  { %200 = vmatprep.subr.mxu0 %v287_v0 }
  0x32   :  { %201 = vmatpush3.msra.mxu0 %v42_v12 }
  0x33   :  { %203 = vmatmul.mubr.msk.f32.vlgmr.msra.gmra.mxu0 %vm61_vm1, %v41_v13 }
  0xf3   :  { %v131_v15 = vpop.f32.mrf.mxu0 }
  0xf4   :  { %v132_v16 = vadd.f32 %v163_v14, %v131_v15 }
  0xf5   :  { %v204_v17 = vpop.f32.mrf.mxu0 }
  0xf6   :  { %v136_v18 = vmul.f32 0.5, %v132_v16 }
  0xf8   :  { %213 = vtanh.f32 %v136_v18 }
  0xf9   :  { %215 = vtanh.f32 %v132_v16 }
 0x105   :  { %v214_v19 = vpop.eup %213 }
 0x106   :  { %v138_v20 = vmul.f32 0.5, %v214_v19  ;;  %v216_v22 = vpop.eup %215 }
 0x108   :  { %v139_v21 = vadd.f32 0.5, %v138_v20 }
 0x10a   :  { %141 = vrot.lane.b32.xlu0 %v139_v21, %s289_s24 }
 0x17c   :  { %v142_v23 = vpop.permute.xlu0 %141 }
 0x17d   :  { %v144_v24 = vmul.f32 %v216_v22, %v142_v23 }
 0x17f   :  { %146 = vst.msk [vmem:[#allocation7] sm:$0xff] %vm145_vm2, %v144_v24 }
 0x180   :  { %268 = shalt.err (!%p265_p0)
}
 0x181   :  { %156 = dma.vmem_to_hbm [thread:$0]  %s154_s26, 128, %s326_s3, [#allocation4]  }
 0x182   :  { %281 = dma.done.wait [#allocation4], 128  }
 0x183   :  { %282 = vsyncadd [#allocation4], 4294967168 }
 0x184   :  { %160 = vsyncpa [#allocation3], 1 }
 0x185   :  { %161 = vsyncpa [#allocation6], 1 }
 0x186   :  { %162 = vsyncpa [#allocation4], 1 }

</bundles_post_ra>
